<compile_context>
chip_gen: v5e
topology: v5e:2x2
jax: 0.10.0
libtpu: 0.0.40
codegen_flags: <defaults>
</compile_context>

<pallas_src>
import jax
import jax.numpy as jnp
import numpy as np
from jax import lax
from jax.experimental import pallas as pl
from jax.experimental.pallas import tpu as pltpu


def _attention_kernel(x_ref, w_ref, b_ref, o_ref):
    # x_ref: (N, C, HW)  input, spatial axis on lanes (lane-dense)
    # w_ref: (C, F)      1x1-conv weight with BN scale pre-folded
    # b_ref: (1, F)      conv bias + BN shift pre-folded
    # o_ref: (N, C, HW)  gated output (F == C)
    x = x_ref[...]                                           # (N, C, HW) f32
    m = jnp.mean(x, axis=2)                                  # (N, C)  global average pool
    y = jnp.dot(m, w_ref[...],
                preferred_element_type=jnp.float32) + b_ref[...]   # (N, F) 1x1 conv (+BN)
    gate = 1.0 / (1.0 + jnp.exp(-y))                         # sigmoid, (N, F)
    o_ref[...] = (x * gate[:, :, None]).astype(o_ref.dtype)  # one lane-dense slab store


def attention_module(x_nchw, conv_w, conv_b, bn_gamma, bn_beta, bn_mean, bn_var, eps=1e-5):
    """x_nchw: (N, C, H, W); conv_w: (F, C, 1, 1) PyTorch OIHW; BN params: (F,)."""
    N, C, H, W = x_nchw.shape
    F = conv_w.shape[0]
    assert F == C, "gating multiply requires n_filters == in_channels"
    HW = H * W

    # Fold inference-mode BatchNorm into the 1x1 conv: y_bn = (m@Wt + b - rm)*scale + beta
    scale = bn_gamma * lax.rsqrt(bn_var + eps)               # (F,)
    w_cf = conv_w.reshape(F, C).T * scale[None, :]           # (C, F)
    b_eff = ((conv_b - bn_mean) * scale + bn_beta).reshape(1, F)

    x3 = x_nchw.reshape(N, C, HW)                            # free, contiguous reshape

    out3 = pl.pallas_call(
        _attention_kernel,
        out_shape=jax.ShapeDtypeStruct((N, C, HW), x_nchw.dtype),
        in_specs=[
            pl.BlockSpec(memory_space=pltpu.MemorySpace.VMEM),
            pl.BlockSpec(memory_space=pltpu.MemorySpace.VMEM),
            pl.BlockSpec(memory_space=pltpu.MemorySpace.VMEM),
        ],
        out_specs=pl.BlockSpec(memory_space=pltpu.MemorySpace.VMEM),
    )(x3, w_cf, b_eff)

    return out3.reshape(N, C, H, W)


def _reference(x, conv_w, conv_b, bn_gamma, bn_beta, bn_mean, bn_var, eps=1e-5):
    m = jnp.mean(x, axis=(2, 3), keepdims=True)              # (N, C, 1, 1)
    y = lax.conv_general_dilated(m, conv_w, (1, 1), "VALID",
                                 dimension_numbers=("NCHW", "OIHW", "NCHW"))
    y = y + conv_b.reshape(1, -1, 1, 1)
    y = (y - bn_mean.reshape(1, -1, 1, 1)) * lax.rsqrt(bn_var.reshape(1, -1, 1, 1) + eps)
    y = y * bn_gamma.reshape(1, -1, 1, 1) + bn_beta.reshape(1, -1, 1, 1)
    s = jax.nn.sigmoid(y)
    return x * s


if __name__ == "__main__":
    N, C, H, W = 2, 4, 16, 16
    n_filters = C                                            # F == C for the gating multiply

    key = jax.random.PRNGKey(0)
    kx, kw, kb, kg, kbe, km, kv = jax.random.split(key, 7)

    x = jax.random.normal(kx, (N, C, H, W), jnp.float32)

    # Conv2d default init range: uniform +/- 1/sqrt(fan_in), fan_in = C*1*1
    bound = float(1.0 / np.sqrt(C))
    conv_w = jax.random.uniform(kw, (n_filters, C, 1, 1), jnp.float32, -bound, bound)
    conv_b = jax.random.uniform(kb, (n_filters,), jnp.float32, -bound, bound)

    bn_gamma = jax.random.uniform(kg, (n_filters,), jnp.float32, 0.5, 1.5)
    bn_beta = jax.random.uniform(kbe, (n_filters,), jnp.float32, -0.5, 0.5)
    bn_mean = 0.1 * jax.random.normal(km, (n_filters,), jnp.float32)
    bn_var = jax.random.uniform(kv, (n_filters,), jnp.float32, 0.5, 1.5)

    out = attention_module(x, conv_w, conv_b, bn_gamma, bn_beta, bn_mean, bn_var)
    out = jax.block_until_ready(out)

    ref = jax.block_until_ready(
        _reference(x, conv_w, conv_b, bn_gamma, bn_beta, bn_mean, bn_var))
    np.testing.assert_allclose(np.asarray(out), np.asarray(ref), rtol=1e-4, atol=1e-4)

    print("KERNEL_OK")
</pallas_src>

<mosaic_0001>
module attributes {stable_mosaic.version = 11 : i64} {
  func.func @_attention_kernel(%arg0: memref<2x4x256xf32, #tpu.memory_space<vmem>>, %arg1: memref<4x4xf32, #tpu.memory_space<vmem>>, %arg2: memref<1x4xf32, #tpu.memory_space<vmem>>, %arg3: memref<2x4x256xf32, #tpu.memory_space<vmem>>) attributes {dimension_semantics = [], scalar_prefetch = 0 : i64, scratch_operands = 0 : i64, tpu.core_type = #tpu.core_type<tc>} {
    %c0 = arith.constant 0 : index
    %c0_0 = arith.constant 0 : index
    %c0_1 = arith.constant 0 : index
    %0 = vector.load %arg0[%c0, %c0_0, %c0_1] : memref<2x4x256xf32, #tpu.memory_space<vmem>>, vector<2x4x256xf32>
    %cst = arith.constant dense<0.000000e+00> : vector<2x4xf32>
    %1 = vector.multi_reduction <add>, %0, %cst [2] : vector<2x4x256xf32> to vector<2x4xf32>
    %cst_2 = arith.constant 2.560000e+02 : f32
    %2 = vector.broadcast %cst_2 : f32 to vector<2x4xf32>
    %3 = arith.divf %1, %2 : vector<2x4xf32>
    %c0_3 = arith.constant 0 : index
    %c0_4 = arith.constant 0 : index
    %4 = vector.load %arg1[%c0_3, %c0_4] : memref<4x4xf32, #tpu.memory_space<vmem>>, vector<4x4xf32>
    %cst_5 = arith.constant dense<0.000000e+00> : vector<2x4xf32>
    %5 = tpu.matmul %3, %4, %cst_5 {dimension_numbers = #tpu.dot_dimension_numbers<[1], [0], [0], [1], [0, 0, 1, 1], [], []>} : vector<2x4xf32>, vector<4x4xf32>, vector<2x4xf32> -> vector<2x4xf32>
    %c0_6 = arith.constant 0 : index
    %c0_7 = arith.constant 0 : index
    %6 = vector.load %arg2[%c0_6, %c0_7] : memref<1x4xf32, #tpu.memory_space<vmem>>, vector<1x4xf32>
    %7 = vector.broadcast %6 : vector<1x4xf32> to vector<2x4xf32>
    %8 = arith.addf %5, %7 : vector<2x4xf32>
    %cst_8 = arith.constant 0.000000e+00 : f32
    %9 = vector.broadcast %cst_8 : f32 to vector<2x4xf32>
    %10 = arith.subf %9, %8 : vector<2x4xf32>
    %11 = math.exp %10 : vector<2x4xf32>
    %cst_9 = arith.constant 1.000000e+00 : f32
    %12 = vector.broadcast %cst_9 : f32 to vector<2x4xf32>
    %13 = arith.addf %12, %11 : vector<2x4xf32>
    %cst_10 = arith.constant 1.000000e+00 : f32
    %14 = vector.broadcast %cst_10 : f32 to vector<2x4xf32>
    %15 = arith.divf %14, %13 : vector<2x4xf32>
    %16 = vector.shape_cast %15 : vector<2x4xf32> to vector<2x4x1xf32>
    %17 = vector.broadcast %16 : vector<2x4x1xf32> to vector<2x4x256xf32>
    %18 = arith.mulf %0, %17 : vector<2x4x256xf32>
    %c0_11 = arith.constant 0 : index
    %c0_12 = arith.constant 0 : index
    %c0_13 = arith.constant 0 : index
    %19 = vector.load %arg3[%c0_11, %c0_12, %c0_13] : memref<2x4x256xf32, #tpu.memory_space<vmem>>, vector<2x4x256xf32>
    tpu.vector_store %arg3[%c0_11, %c0_12, %c0_13], %18 {strides = array<i32>} : memref<2x4x256xf32, #tpu.memory_space<vmem>>, vector<2x4x256xf32>,
    return
  }
}

</mosaic_0001>

<bundles_post_ra>
// kernel: tpu_custom_call.1
= control target key start
LH: loop header
LB: loop body
LE: loop exit
PB: predicated region body
PF: predicated region fallthrough
CT: control target
= control target key end

     0   :  { %8 = vsyncpa [#allocation3], 0  ;;  %s342_s0 = inlined_call_operand.hbm [shape: f32[2,4,256], index: 0, kind: input, shape index: {}]   ;;  %s343_s1 = inlined_call_operand.hbm [shape: f32[4,4], index: 1, kind: input, shape index: {}]   ;;  %s344_s2 = inlined_call_operand.vmem [shape: f32[1,4], index: 2, kind: input, shape index: {}]   ;;  %s345_s3 = inlined_call_operand.hbm [shape: f32[2,4,256], index: 3, kind: output, shape index: {}]  }
   0x1   :  { %9 = vsyncpa [#allocation6], 0 }
   0x2   :  { %10 = vsyncpa [#allocation4], 0  ;;  %s15_s14 = sshll.u32 %s342_s0, 4  ;;  %s284_s15 = smov [#allocation2]   ;;  %s16_s14 = int_to_ptr.hbm [resolvable:$true] %s15_s14 }
   0x3   :  { %s17_s16 = sshll.u32 %s284_s15, 4  ;;  %s29_s19 = sshll.u32 %s343_s1, 4  ;;  %s18_s16 = int_to_ptr.vmem [resolvable:$true] %s17_s16  ;;  %s30_s19 = int_to_ptr.hbm [resolvable:$true] %s29_s19 }
   0x4   :  { %s285_s20 = smov 128   ;;  %s286_s21 = smov 8  }
   0x5   :  { %23 = dma.hbm_to_vmem [thread:$0]  %s16_s14, 256, %s18_s16, [#allocation3], %s285_s20, %s285_s20, %s286_s21  }
   0x6   :  { %s287_s22 = smov [#allocation5]  }
   0x7   :  { %s31_s23 = sshll.u32 %s287_s22, 4  ;;  %s32_s23 = int_to_ptr.vmem [resolvable:$true] %s31_s23 }
   0x8   :  { %34 = dma.hbm_to_vmem [thread:$0]  %s30_s19, 64, %s32_s23, [#allocation6]  }
   0x9   :  { %278 = dma.done.wait [#allocation3], 256  }
   0xa   :  { %279 = vsyncadd [#allocation3], 4294967040 }
   0xb   :  { %280 = dma.done.wait [#allocation6], 64  }
   0xc   :  { %281 = vsyncadd [#allocation6], 4294967232  ;;  %v320_v0 = vld [vmem:[#allocation2] sm:$0xff]  ;;  %v322_v1 = vld [vmem:[#allocation2 + $0x8] sm:$0xff]  ;;  %vm60_vm0 = vcmask 1043456   ;;  %v288_v12 = vmov 256.0   ;;  %v87_v20 = vlaneseq }
   0xd   :  { %49 = vst [vmem:[#allocation1] ss:$2 sm:$0xff] %v320_v0  ;;  %200 = vrcp.f32 %v288_v12  ;;  %v80_v13 = vld [vmem:[#allocation5] sm:$0xf]  ;;  %vm91_vm2 = vcmask 1041409   ;;  %vm93_vm3 = vcmask 31744  }
   0xe   :  { %53 = vst [vmem:[#allocation1 + $0x10] ss:$2 sm:$0xff] %v322_v1  ;;  %188 = vmatpush.msk.msra.mxu0 %vm60_vm0, %v80_v13  ;;  %v88_v22 = vand.u32 127, %v87_v20  ;;  %v140_v29 = vshrl.u32 %v87_v20, 7  ;;  %v199_v30 = vld [vmem:[%s344_s2] ss:$0 sm:$0xff] }
   0xf   :  { %v289_v49 = vmov 839922192   ;;  %s290_s2 = smov [#allocation7]   ;;  %s174_s27 = sshll.u32 %s345_s3, 4  ;;  %s175_s27 = int_to_ptr.hbm [resolvable:$true] %s174_s27 }
  0x10   :  { %197 = vset.pattern.permute.xlu1 %v140_v29  ;;  %198 = vset.pattern.permute.xlu0 %v140_v29  ;;  %v155_v50 = vunpack.c.l.s4 %v289_v49  ;;  %s172_s24 = sshll.u32 %s290_s2, 4  ;;  %s173_s24 = int_to_ptr.vmem [resolvable:$true] %s172_s24 }
  0x12   :  { %v156_v51 = vunpack.c.0.s8 %v155_v50 }
  0x13   :  { %v201_v14 = vpop.eup %200 }
  0x14   :  { %v50_v2 = vld.sshfl [vmem:[#allocation1] sm:$0xff pattern:$0x75316420]  ;;  %v51_v3 = vld.sshfl [vmem:[#allocation1 + $0x8] sm:$0xff pattern:$0x75316420]  ;;  %vm76_vm1 = vweird.f32 %v201_v14 }
  0x15   :  { %v61_v4 = vsel %vm60_vm0, %v50_v2, 0.0  ;;  %v62_v5 = vsel %vm60_vm0, %v51_v3, 0.0  ;;  %v54_v7 = vld.sshfl [vmem:[#allocation1 + $0x10] sm:$0xff pattern:$0x75316420]  ;;  %v72_v15 = vmul.f32 256.0, %v201_v14 }
  0x16   :  { %v63_v6 = vadd.f32 %v62_v5, %v61_v4  ;;  %v55_v8 = vld.sshfl [vmem:[#allocation1 + $0x18] sm:$0xff pattern:$0x75316420]  ;;  %v66_v9 = vsel %vm60_vm0, %v54_v7, 0.0 }
  0x17   :  { %v67_v10 = vsel %vm60_vm0, %v55_v8, 0.0  ;;  %v73_v16 = vsub.f32 1.0, %v72_v15 }
  0x18   :  { %64 = vadd.xlane.f32.xlu0 %v63_v6  ;;  %v68_v11 = vadd.f32 %v67_v10, %v66_v9 }
  0x19   :  { %v74_v17 = vmul.f32 %v201_v14, %v73_v16 }
  0x1b   :  { %v75_v18 = vadd.f32 %v201_v14, %v74_v17 }
  0x1d   :  { %v77_v21 = vsel %vm76_vm1, %v201_v14, %v75_v18 }
  0x20   :  { %69 = vadd.xlane.f32.xlu0 %v68_v11 }
  0x8b   :  { %v65_v19 = vpop.xlane.xlu0 %64 }
  0x8c   :  { %v78_v23 = vmul.f32 %v77_v21, %v65_v19 }
  0x8e   :  { %v89_v26 = vperm.slane %v78_v23, %v88_v22 }
  0x93   :  { %v70_v24 = vpop.xlane.xlu0 %69 }
  0x94   :  { %v79_v25 = vmul.f32 %v77_v21, %v70_v24 }
  0x96   :  { %v90_v27 = vperm.slane %v79_v25, %v88_v22 }
  0x98   :  { %v92_v28 = vsel %vm91_vm2, %v90_v27, %v89_v26 }
  0x99   :  { %189 = vmatmul.msk.f32.vlgmr.msra.gmra.mxu0 %vm93_vm3, %v92_v28 }
 0x116   :  { %v116_v31 = vpop.f32.mrf.mxu0 }
 0x117   :  { %v117_v32 = vadd.f32 %v199_v30, %v116_v31 }
 0x119   :  { %v119_v33 = vsub.f32 0.0, %v117_v32 }
 0x11b   :  { %v120_v34 = vmul.f32 1.442695, %v119_v33 }
 0x11d   :  { %202 = vpow2.f32 %v120_v34 }
 0x123   :  { %v203_v35 = vpop.eup %202 }
 0x124   :  { %v122_v36 = vadd.f32 1.0, %v203_v35 }
 0x126   :  { %204 = vrcp.f32 %v122_v36  ;;  %v134_v40 = vand.u32 2147483648, %v122_v36  ;;  %v132_v42 = vand.u32 2147483647, %v122_v36  ;;  %vm128_vm5 = vweird.f32 %v122_v36 }
 0x128   :  { %v135_v44 = vor.u32 1.1754944e-38, %v134_v40  ;;  %vm133_vm7 = vcmp.eq.f32.partialorder %v132_v42, 8.507059e+37 }
 0x12c   :  { %v205_v37 = vpop.eup %204 }
 0x12d   :  { %v124_v38 = vmul.f32 %v205_v37, %v122_v36  ;;  %vm129_vm4 = vweird.f32 %v205_v37 }
 0x12e   :  { %vm130_vm6 = vmor %vm128_vm5, %vm129_vm4 }
 0x12f   :  { %v125_v39 = vsub.f32 1.0, %v124_v38 }
 0x131   :  { %v126_v41 = vmul.f32 %v205_v37, %v125_v39 }
 0x133   :  { %v127_v43 = vadd.f32 %v205_v37, %v126_v41 }
 0x135   :  { %v131_v45 = vsel %vm130_vm6, %v205_v37, %v127_v43 }
 0x136   :  { %v136_v46 = vsel %vm133_vm7, %v135_v44, %v131_v45 }
 0x137   :  { %v138_v47 = vperm.slane %v136_v46, 0  ;;  %v145_v48 = vperm.slane %v136_v46, 1 }
 0x139   :  { %143 = vperm.xlu1 %197, %v138_v47  }
 0x141   :  { %150 = vperm.xlu1 %197, %v145_v48  }
 0x1ab   :  { %v144_v52 = vpop.permute.xlu1 %143 }
 0x1ac   :  { %v157_v53 = vperm.slane %v144_v52, %v156_v51 }
 0x1ae   :  { %v164_v54 = vmul.f32 %v157_v53, %v320_v0 }
 0x1b0   :  { %166 = vst [vmem:[#allocation7] sm:$0xff] %v164_v54 }
 0x1b3   :  { %v151_v55 = vpop.permute.xlu1 %150 }
 0x1b4   :  { %v161_v56 = vperm.slane %v151_v55, %v156_v51 }
 0x1b6   :  { %v165_v57 = vmul.f32 %v161_v56, %v322_v1 }
 0x1b8   :  { %167 = vst [vmem:[#allocation7 + $0x8] sm:$0xff] %v165_v57 }
 0x1b9   :  { %180 = dma.vmem_to_hbm [thread:$0]  %s173_s24, 256, %s175_s27, [#allocation4], %s285_s20, %s285_s20, %s286_s21  }
 0x1ba   :  { %282 = dma.done.wait [#allocation4], 256  }
 0x1bb   :  { %283 = vsyncadd [#allocation4], 4294967040 }
 0x1bc   :  { %185 = vsyncpa [#allocation3], 1 }
 0x1bd   :  { %186 = vsyncpa [#allocation6], 1 }
 0x1be   :  { %187 = vsyncpa [#allocation4], 1 }

</bundles_post_ra>
